<compile_context>
chip_gen: v7x
topology: tpu7x:2x2x1
jax: 0.10.0
libtpu: 0.0.40
codegen_flags: <defaults>
</compile_context>

<pallas_src>
import jax
import jax.numpy as jnp
from jax.experimental import pallas as pl
from jax.experimental.pallas import tpu as pltpu

LANE = 128
_SMALL_BATCH_MAX = 1024            # below this, one un-gridded call is cheapest
_DEFAULT_BLOCK_B = 8192            # ~8 MiB double-buffered x tile; fits all gens
_VMEM_LIMIT_BYTES = 32 * 1024 * 1024


def _cost(B, IN, OUT):
    return pl.CostEstimate(
        flops=2 * B * IN * OUT,
        transcendentals=0,
        bytes_accessed=4 * (B * IN + OUT * IN + OUT + B * OUT),
    )


def _linear_col_kernel(x_ref, w_ref, b_ref, o_ref):
    """y = x @ w.T + b with a (rows, 1) output block (small / odd-B path)."""
    x = x_ref[...]                                    # (TB, IN)  VMEM
    w = w_ref[...]                                    # (1, IN)   VMEM, row-broadcast
    y = jnp.sum(x * w, axis=-1, keepdims=True)        # VPU mul + XLU lane reduce
    o_ref[...] = (y + b_ref[0]).astype(o_ref.dtype)   # SMEM scalar bias add


def _linear_lane_dense_kernel(x_ref, w_ref, b_ref, o_ref):
    """Same math; (TB, 1) result relaid out to (TB//128, 128) for dense stores."""
    x = x_ref[...]                                            # (TB, IN)
    w = w_ref[...]                                            # (1, IN)
    y = jnp.sum(x * w, axis=-1, keepdims=True) + b_ref[0]     # (TB, 1) f32
    tb = x_ref.shape[0]
    # XLU relayout (free slack in a mem-bound kernel) -> lane-dense store.
    o_ref[...] = y.reshape(tb // LANE, LANE).astype(o_ref.dtype)


def simple_classifier_forward(x, weight, bias, *, block_b=_DEFAULT_BLOCK_B):
    """Pallas equivalent of nn.Linear(10, 1) forward: y = x @ W^T + b.

    x:      (B, 10) float32
    weight: (1, 10) float32   (PyTorch layout: [out_features, in_features])
    bias:   (1,)    float32
    returns (B, 1)  float32
    """
    B, IN = x.shape
    OUT, IN_w = weight.shape
    assert IN == IN_w and OUT == 1, "SimpleClassifier is Linear(10, 1)"
    bias_1d = bias.reshape(OUT).astype(x.dtype)

    if B < _SMALL_BATCH_MAX:
        # Single invocation: no grid, no pipeline prologue/epilogue.
        return pl.pallas_call(
            _linear_col_kernel,
            out_shape=jax.ShapeDtypeStruct((B, OUT), x.dtype),
            in_specs=[
                pl.BlockSpec(memory_space=pltpu.MemorySpace.VMEM),
                pl.BlockSpec(memory_space=pltpu.MemorySpace.VMEM),
                pl.BlockSpec(memory_space=pltpu.MemorySpace.SMEM),
            ],
            out_specs=pl.BlockSpec(memory_space=pltpu.MemorySpace.VMEM),
            cost_estimate=_cost(B, IN, OUT),
        )(x, weight, bias_1d)

    compiler_params = pltpu.CompilerParams(
        dimension_semantics=("parallel",),        # megacore / dual-TC split
        vmem_limit_bytes=_VMEM_LIMIT_BYTES,       # v5e default (16 MiB) is too low
    )

    if B % LANE == 0:
        # Lane-dense path.  block_b is kept a multiple of 1024 so the
        # (block_b//128, 128) output block has a sublane dim divisible by 8.
        blk = max(1024, min(block_b, (B // 1024) * 1024))
        nb = pl.cdiv(B, blk)                      # partial final block is masked
        rows = B // LANE
        out = pl.pallas_call(
            _linear_lane_dense_kernel,
            out_shape=jax.ShapeDtypeStruct((rows, LANE), x.dtype),
            grid=(nb,),
            in_specs=[
                pl.BlockSpec((blk, IN), lambda i: (i, 0)),
                pl.BlockSpec((OUT, IN), lambda i: (0, 0)),   # constant idx: DMA'd once
                pl.BlockSpec(memory_space=pltpu.MemorySpace.SMEM),
            ],
            out_specs=pl.BlockSpec((blk // LANE, LANE), lambda i: (i, 0)),
            compiler_params=compiler_params,
            cost_estimate=_cost(B, IN, OUT),
        )(x, weight, bias_1d)
        # (B//128, 128) and (B, 1) share the same row-major element order, so
        # this reshape is layout-preserving -- no extra HBM pass, no slice.
        return out.reshape(B, OUT)

    # Odd batch (not a multiple of 128): gridded width-1-output fallback.
    # Still no pad / no trailing slice -- Pallas masks the partial final block.
    # TODO(synk): lane-dense output needs B % 128 == 0; rarely hit at large B.
    blk = min(block_b, (B // 8) * 8)
    nb = pl.cdiv(B, blk)
    return pl.pallas_call(
        _linear_col_kernel,
        out_shape=jax.ShapeDtypeStruct((B, OUT), x.dtype),
        grid=(nb,),
        in_specs=[
            pl.BlockSpec((blk, IN), lambda i: (i, 0)),
            pl.BlockSpec((OUT, IN), lambda i: (0, 0)),
            pl.BlockSpec(memory_space=pltpu.MemorySpace.SMEM),
        ],
        out_specs=pl.BlockSpec((blk, OUT), lambda i: (i, 0)),
        compiler_params=compiler_params,
        cost_estimate=_cost(B, IN, OUT),
    )(x, weight, bias_1d)


if __name__ == "__main__":
    key = jax.random.PRNGKey(0)
    kx, kw, kb = jax.random.split(key, 3)

    IN, OUT = 10, 1  # nn.Linear(10, 1)
    weight = jax.random.normal(kw, (OUT, IN), dtype=jnp.float32) * 0.1
    bias = jax.random.normal(kb, (OUT,), dtype=jnp.float32) * 0.1

    # 1) Small batch -> un-gridded path.
    x_small = jax.random.normal(kx, (8, IN), dtype=jnp.float32)
    out_small = jax.block_until_ready(simple_classifier_forward(x_small, weight, bias))
    ref_small = x_small @ weight.T + bias
    assert out_small.shape == (8, OUT)
    assert jnp.allclose(out_small, ref_small, atol=1e-5, rtol=1e-5)

    # 2) Gridded lane-dense path (B % 128 == 0), small block to exercise the
    #    grid, the constant-weight block reuse, and a masked partial block.
    x_big = jax.random.normal(kx, (1920, IN), dtype=jnp.float32)
    out_big = jax.block_until_ready(
        simple_classifier_forward(x_big, weight, bias, block_b=1024))
    ref_big = x_big @ weight.T + bias
    assert out_big.shape == (1920, OUT)
    assert jnp.allclose(out_big, ref_big, atol=1e-5, rtol=1e-5)

    # 3) Gridded fallback path (B not a multiple of 128).
    x_odd = jax.random.normal(kx, (1100, IN), dtype=jnp.float32)
    out_odd = jax.block_until_ready(
        simple_classifier_forward(x_odd, weight, bias, block_b=1024))
    ref_odd = x_odd @ weight.T + bias
    assert out_odd.shape == (1100, OUT)
    assert jnp.allclose(out_odd, ref_odd, atol=1e-5, rtol=1e-5)

    print("KERNEL_OK")
</pallas_src>

<mosaic_0001>
module attributes {stable_mosaic.version = 11 : i64} {
  func.func @_linear_col_kernel(%arg0: memref<8x10xf32, #tpu.memory_space<vmem>>, %arg1: memref<1x10xf32, #tpu.memory_space<vmem>>, %arg2: memref<1xf32, #tpu.memory_space<smem>>, %arg3: memref<8x1xf32, #tpu.memory_space<vmem>>) attributes {dimension_semantics = [], scalar_prefetch = 0 : i64, scratch_operands = 0 : i64, tpu.core_type = #tpu.core_type<tc>} {
    %c0 = arith.constant 0 : index
    %c0_0 = arith.constant 0 : index
    %0 = vector.load %arg0[%c0, %c0_0] : memref<8x10xf32, #tpu.memory_space<vmem>>, vector<8x10xf32>
    %c0_1 = arith.constant 0 : index
    %c0_2 = arith.constant 0 : index
    %1 = vector.load %arg1[%c0_1, %c0_2] : memref<1x10xf32, #tpu.memory_space<vmem>>, vector<1x10xf32>
    %2 = vector.broadcast %1 : vector<1x10xf32> to vector<8x10xf32>
    %3 = arith.mulf %0, %2 : vector<8x10xf32>
    %cst = arith.constant dense<0.000000e+00> : vector<8xf32>
    %4 = vector.multi_reduction <add>, %3, %cst [1] : vector<8x10xf32> to vector<8xf32>
    %5 = vector.shape_cast %4 : vector<8xf32> to vector<8x1xf32>
    %c0_3 = arith.constant 0 : index
    %6 = memref.load %arg2[%c0_3] : memref<1xf32, #tpu.memory_space<smem>>
    %7 = vector.broadcast %6 : f32 to vector<8x1xf32>
    %8 = arith.addf %5, %7 : vector<8x1xf32>
    %c0_4 = arith.constant 0 : index
    %c0_5 = arith.constant 0 : index
    %9 = vector.load %arg3[%c0_4, %c0_5] : memref<8x1xf32, #tpu.memory_space<vmem>>, vector<8x1xf32>
    tpu.vector_store %arg3[%c0_4, %c0_5], %8 {strides = array<i32>} : memref<8x1xf32, #tpu.memory_space<vmem>>, vector<8x1xf32>,
    return
  }
}

</mosaic_0001>

<bundles_post_ra>
// kernel: tpu_custom_call.1
= control target key start
LH: loop header
LB: loop body
LE: loop exit
PB: predicated region body
PF: predicated region fallthrough
CT: control target
= control target key end

     0   :  { %9 = vsyncpa [#allocation4], 0  ;;  %s76_s12 = smov [#allocation3]   ;;  %s118_s0 = inlined_call_operand.hbm [shape: f32[8,10], index: 0, kind: input, shape index: {}]   ;;  %s119_s1 = inlined_call_operand.vmem [shape: f32[1,10], index: 1, kind: input, shape index: {}]   ;;  %s120_s2 = inlined_call_operand.<no memory space> [shape: f32[1], index: 2, kind: input, shape index: {}]   ;;  %s121_s3 = inlined_call_operand.vmem [shape: f32[8,1], index: 3, kind: output, shape index: {}]  }
   0x1   :  { %s16_s13 = sshll.u32 %s76_s12, 4  ;;  %s52_s16 = scalar_lea.hbm %s118_s0, 128  ;;  %s17_s13 = int_to_ptr.vmem [resolvable:$true] %s16_s13 }
   0x2   :  { %p53_p0 = scmp.ne.s32.totalorder %s118_s0, %s52_s16  ;;  %p56_p1 = scmp.lt.u32.totalorder %s52_s16, %s118_s0 }
   0x4   :  { %p58_p2 = pnand %p56_p1, %p53_p0 }
   0x6   :  { %61 = shalt.err (!%p58_p2)
}
   0x7   :  { %s62_s21 = scalar_lea.vmem %s17_s13, 128  ;;  %p67_p4 = scmp.lt.s32.totalorder %s17_s13, %s17_s13 }
   0x8   :  { %p63_p3 = scmp.ne.s32.totalorder %s17_s13, %s62_s21  ;;  %p68_p5 = scmp.lt.s32.totalorder %s62_s21, %s62_s21 }
   0xa   :  { %p69_p6 = por %p68_p5, %p67_p4 }
   0xc   :  { %p70_p7 = pnand %p69_p6, %p63_p3 }
   0xe   :  { %73 = shalt.err (!%p70_p7)
}
   0xf   :  { %19 = dma.hbm_to_vmem [thread:$0]  %s118_s0, 128, %s17_s13, [#allocation4]  }
  0x10   :  { %74 = dma.done.wait [#allocation4], 128  }
  0x11   :  { %75 = vsyncadd [#allocation4], 4294967168  ;;  %v27_v0 = vld [vmem:[#allocation3] sm:$0xff]  ;;  %vm36_vm0 = vcmask 80896   ;;  %v41_v4 = vstv %s120_s2  ;;  %vm43_vm1 = vcmask 7168  }
  0x12   :  { %v50_v1 = vld [vmem:[%s119_s1] ss:$0 sm:$0xff] }
  0x13   :  { %v35_v2 = vmul.f32 %v50_v1, %v27_v0 }
  0x15   :  { %v37_v3 = vsel %vm36_vm0, %v35_v2, 0.0 }
  0x16   :  { %38 = vadd.xlane.f32.xlu0 %v37_v3 }
  0xa3   :  { %v39_v5 = vpop.xlane.xlu0 %38 }
  0xa4   :  { %v42_v6 = vadd.f32 %v41_v4, %v39_v5 }
  0xa6   :  { %44 = vst.msk [vmem:[%s121_s3] sm:$0xff] %vm43_vm1, %v42_v6 }
  0xa7   :  { %49 = vsyncpa [#allocation4], 1 }

</bundles_post_ra>
